<compile_context>
chip_gen: v7x
topology: tpu7x:2x2x1
jax: 0.10.0
libtpu: 0.0.40
codegen_flags: <defaults>
</compile_context>

<pallas_src>
import jax
import jax.numpy as jnp
from jax.experimental import pallas as pl
from jax.experimental.pallas import tpu as pltpu

_P = 4    # batch rows packed per slab row  (P * 32 = 128 -> lane-dense output)
_H = 32   # torso hidden width (fixed by the module)


def _backbone_kernel(x_ref, w1_ref, b1_ref, w2_ref, b2_ref, o_ref):
    # x_ref : (TR, P*F_in)   one packed batch tile (P batch rows per slab row)
    # w1_ref: (P*F_in, P*H)  block-diag kron(I_P, W1^T), resident in VMEM
    # b1_ref: (1, P*H)       tiled bias, f32
    # w2_ref: (P*H, P*H)     block-diag kron(I_P, W2^T), resident in VMEM
    # b2_ref: (1, P*H)       tiled bias, f32
    # o_ref : (TR, P*H)      packed embedding slab (128 lanes wide)
    x = x_ref[...]                                           # native dtype -> MXU
    h = jnp.dot(x, w1_ref[...], preferred_element_type=jnp.float32)
    h = jnp.maximum(h + b1_ref[...], 0.0)                    # bias + ReLU in f32
    h = h.astype(x.dtype)                                    # bf16 2nd matmul on bf16 path
    y = jnp.dot(h, w2_ref[...], preferred_element_type=jnp.float32)
    y = jnp.maximum(y + b2_ref[...], 0.0)                    # bias + ReLU in f32
    o_ref[...] = y.astype(o_ref.dtype)                       # unmasked lane-dense store


def backbone_forward(inputs, w1, b1, w2, b2, *, tile_b=16384):
    """Forward of Backbone.torso.

    inputs: (B, F_in)                activations (f32 or bf16)
    w1:     (32, F_in), b1: (32,)    PyTorch-layout Linear(input_size, 32)
    w2:     (32, 32),   b2: (32,)    PyTorch-layout Linear(32, 32)
    returns (B, 32) embedding, dtype of `inputs`.
    """
    B, F_in = inputs.shape
    H = _H
    P = _P
    assert w1.shape == (H, F_in)
    assert w2.shape == (H, H)
    assert b1.shape == (H,) and b2.shape == (H,)
    out_dtype = inputs.dtype

    # ---- one-time layout prep in the wrapper (outside the kernel) ----------
    # Block-diagonal weights apply the same Linear to the P batch rows packed
    # into each slab row with a single lane-dense matmul.
    w1_big = jnp.kron(jnp.eye(P, dtype=w1.dtype), w1.T)          # (P*F_in, P*H)
    w2_big = jnp.kron(jnp.eye(P, dtype=w2.dtype), w2.T)          # (P*H,   P*H)
    b1_big = jnp.tile(b1.astype(jnp.float32), P).reshape(1, P * H)
    b2_big = jnp.tile(b2.astype(jnp.float32), P).reshape(1, P * H)

    # ---- pad batch to a multiple of 8 and repack (free contiguous reshape) -
    B_pad = ((B + 7) // 8) * 8
    x = inputs if B_pad == B else jnp.pad(inputs, ((0, B_pad - B), (0, 0)))
    x_packed = x.reshape(B_pad // P, P * F_in)
    R = B_pad // P                                               # packed rows

    # ---- batch tile selection: big blocks, balanced grid -------------------
    if B_pad <= tile_b:
        TR = R                                   # single block == full array
    else:
        nt = pl.cdiv(B_pad, tile_b)              # grid >= 2 (megacore-friendly)
        tb = ((pl.cdiv(B_pad, nt) + 31) // 32) * 32   # multiple of 32 -> TR % 8 == 0
        TR = tb // P
    grid = (pl.cdiv(R, TR),)

    out_packed = pl.pallas_call(
        _backbone_kernel,
        out_shape=jax.ShapeDtypeStruct((R, P * H), out_dtype),
        grid_spec=pltpu.PrefetchScalarGridSpec(
            num_scalar_prefetch=0,
            grid=grid,
            in_specs=[
                pl.BlockSpec((TR, P * F_in), lambda i: (i, 0)),      # streamed tile
                pl.BlockSpec((P * F_in, P * H), lambda i: (0, 0)),   # resident
                pl.BlockSpec((1, P * H), lambda i: (0, 0)),          # resident
                pl.BlockSpec((P * H, P * H), lambda i: (0, 0)),      # resident
                pl.BlockSpec((1, P * H), lambda i: (0, 0)),          # resident
            ],
            out_specs=pl.BlockSpec((TR, P * H), lambda i: (i, 0)),
        ),
        compiler_params=pltpu.CompilerParams(
            dimension_semantics=("parallel",),        # megacore split on v7x
            vmem_limit_bytes=48 * 1024 * 1024,        # safe on v5e/v6e/v7x
        ),
    )(x_packed, w1_big, b1_big, w2_big, b2_big)

    # Unpack (free contiguous reshape) and drop batch padding.
    return out_packed.reshape(B_pad, H)[:B]


def _ref_forward(inputs, w1, b1, w2, b2):
    h = jnp.maximum(inputs @ w1.T + b1[None, :], 0.0)
    return jnp.maximum(h @ w2.T + b2[None, :], 0.0)


if __name__ == "__main__":
    key = jax.random.PRNGKey(0)
    k_x, k_x2, k_w1, k_b1, k_w2, k_b2 = jax.random.split(key, 6)

    F_in, H = 16, 32

    # PyTorch-Linear-like uniform(-1/sqrt(fan_in), 1/sqrt(fan_in)) init.
    bound1 = 1.0 / jnp.sqrt(jnp.float32(F_in))
    w1 = jax.random.uniform(k_w1, (H, F_in), jnp.float32, -bound1, bound1)
    b1 = jax.random.uniform(k_b1, (H,), jnp.float32, -bound1, bound1)
    bound2 = 1.0 / jnp.sqrt(jnp.float32(H))
    w2 = jax.random.uniform(k_w2, (H, H), jnp.float32, -bound2, bound2)
    b2 = jax.random.uniform(k_b2, (H,), jnp.float32, -bound2, bound2)

    # 1) small single-tile batch, f32
    B = 8
    x = jax.random.normal(k_x, (B, F_in), jnp.float32)
    out = jax.block_until_ready(backbone_forward(x, w1, b1, w2, b2))
    ref = _ref_forward(x, w1, b1, w2, b2)
    assert out.shape == (B, H)
    assert jnp.allclose(out, ref, atol=1e-5, rtol=1e-5), "f32 single-tile mismatch"

    # 2) multi-tile grid with partial last tile and non-multiple-of-8 batch
    B2 = 70
    x2 = jax.random.normal(k_x2, (B2, F_in), jnp.float32)
    out2 = jax.block_until_ready(backbone_forward(x2, w1, b1, w2, b2, tile_b=32))
    ref2 = _ref_forward(x2, w1, b1, w2, b2)
    assert out2.shape == (B2, H)
    assert jnp.allclose(out2, ref2, atol=1e-5, rtol=1e-5), "f32 multi-tile mismatch"

    # 3) bf16 I/O path (f32 MXU accumulation inside; halves HBM traffic)
    out_bf16 = jax.block_until_ready(
        backbone_forward(x2.astype(jnp.bfloat16),
                         w1.astype(jnp.bfloat16), b1,
                         w2.astype(jnp.bfloat16), b2, tile_b=32))
    assert out_bf16.dtype == jnp.bfloat16
    assert jnp.allclose(out_bf16.astype(jnp.float32), ref2, atol=1e-1, rtol=1e-1), \
        "bf16 path mismatch"

    print("KERNEL_OK")
</pallas_src>

<mosaic_0001>
module attributes {stable_mosaic.version = 11 : i64} {
  func.func @_backbone_kernel(%arg0: i32, %arg1: memref<2x64xf32, #tpu.memory_space<vmem>>, %arg2: memref<64x128xf32, #tpu.memory_space<vmem>>, %arg3: memref<1x128xf32, #tpu.memory_space<vmem>>, %arg4: memref<128x128xf32, #tpu.memory_space<vmem>>, %arg5: memref<1x128xf32, #tpu.memory_space<vmem>>, %arg6: memref<2x128xf32, #tpu.memory_space<vmem>>) attributes {dimension_semantics = [#tpu.dimension_semantics<parallel>], iteration_bounds = array<i64: 1>, scalar_prefetch = 0 : i64, scratch_operands = 0 : i64, tpu.core_type = #tpu.core_type<tc>, window_params = [{transform_indices = @transform_0, window_bounds = array<i64: 2, 64>}, {pipeline_mode = #tpu.pipeline_mode<synchronous>, transform_indices = @transform_1, window_bounds = array<i64: 64, 128>}, {pipeline_mode = #tpu.pipeline_mode<synchronous>, transform_indices = @transform_2, window_bounds = array<i64: 1, 128>}, {pipeline_mode = #tpu.pipeline_mode<synchronous>, transform_indices = @transform_3, window_bounds = array<i64: 128, 128>}, {pipeline_mode = #tpu.pipeline_mode<synchronous>, transform_indices = @transform_4, window_bounds = array<i64: 1, 128>}, {transform_indices = @transform_5, window_bounds = array<i64: 2, 128>}]} {
    %c0 = arith.constant 0 : index
    %c0_0 = arith.constant 0 : index
    %0 = vector.load %arg1[%c0, %c0_0] : memref<2x64xf32, #tpu.memory_space<vmem>>, vector<2x64xf32>
    %c0_1 = arith.constant 0 : index
    %c0_2 = arith.constant 0 : index
    %1 = vector.load %arg2[%c0_1, %c0_2] : memref<64x128xf32, #tpu.memory_space<vmem>>, vector<64x128xf32>
    %cst = arith.constant dense<0.000000e+00> : vector<2x128xf32>
    %2 = tpu.matmul %0, %1, %cst {dimension_numbers = #tpu.dot_dimension_numbers<[1], [0], [0], [1], [0, 0, 1, 1], [], []>} : vector<2x64xf32>, vector<64x128xf32>, vector<2x128xf32> -> vector<2x128xf32>
    %c0_3 = arith.constant 0 : index
    %c0_4 = arith.constant 0 : index
    %3 = vector.load %arg3[%c0_3, %c0_4] : memref<1x128xf32, #tpu.memory_space<vmem>>, vector<1x128xf32>
    %4 = vector.broadcast %3 : vector<1x128xf32> to vector<2x128xf32>
    %5 = arith.addf %2, %4 : vector<2x128xf32>
    %cst_5 = arith.constant 0.000000e+00 : f32
    %6 = vector.broadcast %cst_5 : f32 to vector<2x128xf32>
    %7 = arith.maximumf %5, %6 : vector<2x128xf32>
    %c0_6 = arith.constant 0 : index
    %c0_7 = arith.constant 0 : index
    %8 = vector.load %arg4[%c0_6, %c0_7] : memref<128x128xf32, #tpu.memory_space<vmem>>, vector<128x128xf32>
    %cst_8 = arith.constant dense<0.000000e+00> : vector<2x128xf32>
    %9 = tpu.matmul %7, %8, %cst_8 {dimension_numbers = #tpu.dot_dimension_numbers<[1], [0], [0], [1], [0, 0, 1, 1], [], []>} : vector<2x128xf32>, vector<128x128xf32>, vector<2x128xf32> -> vector<2x128xf32>
    %c0_9 = arith.constant 0 : index
    %c0_10 = arith.constant 0 : index
    %10 = vector.load %arg5[%c0_9, %c0_10] : memref<1x128xf32, #tpu.memory_space<vmem>>, vector<1x128xf32>
    %11 = vector.broadcast %10 : vector<1x128xf32> to vector<2x128xf32>
    %12 = arith.addf %9, %11 : vector<2x128xf32>
    %cst_11 = arith.constant 0.000000e+00 : f32
    %13 = vector.broadcast %cst_11 : f32 to vector<2x128xf32>
    %14 = arith.maximumf %12, %13 : vector<2x128xf32>
    %c0_12 = arith.constant 0 : index
    %c0_13 = arith.constant 0 : index
    %15 = vector.load %arg6[%c0_12, %c0_13] : memref<2x128xf32, #tpu.memory_space<vmem>>, vector<2x128xf32>
    tpu.vector_store %arg6[%c0_12, %c0_13], %14 {strides = array<i32>} : memref<2x128xf32, #tpu.memory_space<vmem>>, vector<2x128xf32>,
    return
  }
  func.func @transform_0(%arg0: i32) -> (i32, i32) {
    %c0_i32 = arith.constant 0 : i32
    %c0_i32_0 = arith.constant 0 : i32
    return %arg0, %c0_i32 : i32, i32
  }
  func.func @transform_1(%arg0: i32) -> (i32, i32) {
    %c0_i32 = arith.constant 0 : i32
    %c0_i32_0 = arith.constant 0 : i32
    %c0_i32_1 = arith.constant 0 : i32
    return %c0_i32, %c0_i32_0 : i32, i32
  }
  func.func @transform_2(%arg0: i32) -> (i32, i32) {
    %c0_i32 = arith.constant 0 : i32
    %c0_i32_0 = arith.constant 0 : i32
    %c0_i32_1 = arith.constant 0 : i32
    return %c0_i32, %c0_i32_0 : i32, i32
  }
  func.func @transform_3(%arg0: i32) -> (i32, i32) {
    %c0_i32 = arith.constant 0 : i32
    %c0_i32_0 = arith.constant 0 : i32
    %c0_i32_1 = arith.constant 0 : i32
    return %c0_i32, %c0_i32_0 : i32, i32
  }
  func.func @transform_4(%arg0: i32) -> (i32, i32) {
    %c0_i32 = arith.constant 0 : i32
    %c0_i32_0 = arith.constant 0 : i32
    %c0_i32_1 = arith.constant 0 : i32
    return %c0_i32, %c0_i32_0 : i32, i32
  }
  func.func @transform_5(%arg0: i32) -> (i32, i32) {
    %c0_i32 = arith.constant 0 : i32
    %c0_i32_0 = arith.constant 0 : i32
    return %arg0, %c0_i32 : i32, i32
  }
}

</mosaic_0001>

<bundles_post_ra>
// kernel: tpu_custom_call.1
= control target key start
LH: loop header
LB: loop body
LE: loop exit
PB: predicated region body
PF: predicated region fallthrough
CT: control target
= control target key end

     0   :  { %10 = vsyncpa [#allocation3], 0  ;;  %s583_s0 = inlined_call_operand.hbm [shape: f32[2,64], index: 0, kind: input, shape index: {}]   ;;  %s584_s1 = inlined_call_operand.hbm [shape: f32[64,128], index: 1, kind: input, shape index: {}]   ;;  %s585_s2 = inlined_call_operand.vmem [shape: f32[1,128], index: 2, kind: input, shape index: {}]   ;;  %s586_s3 = inlined_call_operand.hbm [shape: f32[128,128], index: 3, kind: input, shape index: {}]   ;;  %s587_s4 = inlined_call_operand.vmem [shape: f32[1,128], index: 4, kind: input, shape index: {}]   ;;  %s588_s5 = inlined_call_operand.hbm [shape: f32[2,128], index: 5, kind: output, shape index: {}]  }
   0x1   :  { %11 = vsyncpa [#allocation6], 0 }
   0x2   :  { %12 = vsyncpa [#allocation4], 0  ;;  %s484_s18 = smov [#allocation5]   ;;  %s390_s22 = scalar_lea.hbm %s584_s1, 1024 }
   0x3   :  { %s28_s19 = sshll.u32 %s484_s18, 4  ;;  %p391_p0 = scmp.ne.s32.totalorder %s584_s1, %s390_s22  ;;  %s29_s19 = int_to_ptr.vmem [resolvable:$true] %s28_s19 }
   0x4   :  { %p394_p1 = scmp.lt.u32.totalorder %s390_s22, %s584_s1 }
   0x6   :  { %p396_p2 = pnand %p394_p1, %p391_p0 }
   0x8   :  { %399 = shalt.err (!%p396_p2)
}
   0x9   :  { %s400_s27 = scalar_lea.vmem %s29_s19, 1024  ;;  %p405_p4 = scmp.lt.s32.totalorder %s29_s19, %s29_s19 }
   0xa   :  { %p401_p3 = scmp.ne.s32.totalorder %s29_s19, %s400_s27  ;;  %p406_p5 = scmp.lt.s32.totalorder %s400_s27, %s400_s27 }
   0xc   :  { %p407_p6 = por %p406_p5, %p405_p4 }
   0xe   :  { %p408_p7 = pnand %p407_p6, %p401_p3 }
  0x10   :  { %411 = shalt.err (!%p408_p7)
}
  0x11   :  { %s485_s28 = smov 128   ;;  %s486_s29 = smov 8  }
  0x12   :  { %34 = dma.hbm_to_vmem [thread:$0]  %s584_s1, 1024, %s29_s19, [#allocation6], %s485_s28, %s485_s28, %s486_s29  }
  0x13   :  { %s487_s7 = smov [#allocation2]   ;;  %s488_s9 = smov [#allocation7]  }
  0x14   :  { %s19_s8 = sshll.u32 %s487_s7, 4  ;;  %s42_s10 = sshll.u32 %s488_s9, 4  ;;  %s20_s8 = int_to_ptr.vmem [resolvable:$true] %s19_s8  ;;  %s43_s10 = int_to_ptr.vmem [resolvable:$true] %s42_s10 }
  0x15   :  { %s412_s13 = scalar_lea.hbm %s583_s0, 32 }
  0x16   :  { %p413_p8 = scmp.ne.s32.totalorder %s583_s0, %s412_s13  ;;  %p416_p9 = scmp.lt.u32.totalorder %s412_s13, %s583_s0 }
  0x18   :  { %p418_p10 = pnand %p416_p9, %p413_p8 }
  0x1a   :  { %421 = shalt.err (!%p418_p10)
}
  0x1b   :  { %s422_s1 = scalar_lea.vmem %s20_s8, 32  ;;  %p427_p12 = scmp.lt.s32.totalorder %s20_s8, %s20_s8 }
  0x1c   :  { %p423_p11 = scmp.ne.s32.totalorder %s20_s8, %s422_s1  ;;  %p428_p13 = scmp.lt.s32.totalorder %s422_s1, %s422_s1 }
  0x1e   :  { %p429_p0 = por %p428_p13, %p427_p12 }
  0x20   :  { %p430_p1 = pnand %p429_p0, %p423_p11 }
  0x22   :  { %433 = shalt.err (!%p430_p1)
}
  0x23   :  { %22 = dma.hbm_to_vmem [thread:$0]  %s583_s0, 32, %s20_s8, [#allocation3]  }
  0x24   :  { %s434_s22 = scalar_lea.hbm %s586_s3, 2048 }
  0x25   :  { %p435_p2 = scmp.ne.s32.totalorder %s586_s3, %s434_s22  ;;  %p438_p3 = scmp.lt.u32.totalorder %s434_s22, %s586_s3 }
  0x27   :  { %p440_p4 = pnand %p438_p3, %p435_p2 }
  0x29   :  { %443 = shalt.err (!%p440_p4)
}
  0x2a   :  { %s444_s27 = scalar_lea.vmem %s43_s10, 2048  ;;  %p449_p6 = scmp.lt.s32.totalorder %s43_s10, %s43_s10 }
  0x2b   :  { %p445_p5 = scmp.ne.s32.totalorder %s43_s10, %s444_s27  ;;  %p450_p7 = scmp.lt.s32.totalorder %s444_s27, %s444_s27 }
  0x2d   :  { %p451_p8 = por %p450_p7, %p449_p6 }
  0x2f   :  { %p452_p9 = pnand %p451_p8, %p445_p5 }
  0x31   :  { %455 = shalt.err (!%p452_p9)
}
  0x32   :  { %48 = dma.hbm_to_vmem [thread:$0]  %s586_s3, 2048, %s43_s10, [#allocation6], %s485_s28, %s485_s28, %s486_s29  }
  0x33   :  { %478 = dma.done.wait [#allocation3], 32  }
  0x34   :  { %479 = vsyncadd [#allocation3], 4294967264 }
  0x35   :  { %480 = dma.done.wait [#allocation6], 3072  }
  0x36   :  { %481 = vsyncadd [#allocation6], 4294964224  ;;  %v489_v0 = vmov 0.0|0.0   ;;  %vm490_vm0 = vmmov 0   ;;  %v491_v1 = vmov 0.0   ;;  %v61_v2 = vld [vmem:[#allocation5] sm:$0xff] }
  0x37   :  { %345 = vmatprep.subr.bf16.mxu0 %v489_v0  ;;  %307 = vmatprep.mubr.msk.f32.mxu0 %vm490_vm0, %v491_v1  ;;  %v62_v3 = vld [vmem:[#allocation5 + $0x8] sm:$0xff]  ;;  %v63_v4 = vld [vmem:[#allocation5 + $0x10] sm:$0xff]  ;;  %v64_v6 = vld [vmem:[#allocation5 + $0x18] sm:$0xff]  ;;  %vm76_vm1 = vcmask 523264   ;;  %s492_s7 = smov [#allocation8]  }
  0x38   :  { %357 = vmatprep.subr.bf16.mxu1 %v489_v0  ;;  %342 = vmatprep.mubr.msk.f32.mxu1 %vm490_vm0, %v491_v1  ;;  %v346_v5 = vpack.c.bf16 %v62_v3, %v61_v2  ;;  %v349_v7 = vpack.c.bf16 %v64_v6, %v63_v4  ;;  %v151_v8 = vld [vmem:[#allocation7] sm:$0xff]  ;;  %v152_v9 = vld [vmem:[#allocation7 + $0x8] sm:$0xff]  ;;  %v153_v10 = vld [vmem:[#allocation7 + $0x10] sm:$0xff]  ;;  %s252_s8 = sshll.u32 %s492_s7, 4  ;;  %s253_s8 = int_to_ptr.vmem [resolvable:$true] %s252_s8 }
  0x39   :  { %v65_v11 = vld [vmem:[#allocation5 + $0x20] sm:$0xff]  ;;  %v66_v12 = vld [vmem:[#allocation5 + $0x28] sm:$0xff]  ;;  %v358_v13 = vpack.c.bf16 %v152_v9, %v151_v8  ;;  %v154_v14 = vld [vmem:[#allocation7 + $0x18] sm:$0xff]  ;;  %s456_s9 = scalar_lea.vmem %s253_s8, 32  ;;  %p461_p11 = scmp.lt.s32.totalorder %s253_s8, %s253_s8 }
  0x3a   :  { %347 = vmatpush3.bf16.msra.mxu0 %v346_v5  ;;  %v361_v15 = vpack.c.bf16 %v154_v14, %v153_v10  ;;  %v352_v16 = vpack.c.bf16 %v66_v12, %v65_v11  ;;  %v155_v17 = vld [vmem:[#allocation7 + $0x20] sm:$0xff]  ;;  %v156_v18 = vld [vmem:[#allocation7 + $0x28] sm:$0xff]  ;;  %v67_v19 = vld [vmem:[#allocation5 + $0x30] sm:$0xff]  ;;  %p457_p10 = scmp.ne.s32.totalorder %s253_s8, %s456_s9  ;;  %p462_p12 = scmp.lt.s32.totalorder %s456_s9, %s456_s9 }
  0x3b   :  { %348 = vmatprep.subr.bf16.mxu0 %v489_v0  ;;  %359 = vmatpush3.bf16.msra.mxu1 %v358_v13  ;;  %v68_v20 = vld [vmem:[#allocation5 + $0x38] sm:$0xff]  ;;  %v364_v21 = vpack.c.bf16 %v156_v18, %v155_v17  ;;  %v157_v23 = vld [vmem:[#allocation7 + $0x30] sm:$0xff]  ;;  %v159_v27 = vld [vmem:[#allocation7 + $0x40] sm:$0xff] }
  0x3c   :  { %360 = vmatprep.subr.bf16.mxu1 %v489_v0  ;;  %v355_v22 = vpack.c.bf16 %v68_v20, %v67_v19  ;;  %v158_v24 = vld [vmem:[#allocation7 + $0x38] sm:$0xff]  ;;  %v160_v28 = vld [vmem:[#allocation7 + $0x48] sm:$0xff]  ;;  %v161_v30 = vld [vmem:[#allocation7 + $0x50] sm:$0xff]  ;;  %p463_p13 = por %p462_p12, %p461_p11 }
  0x3d   :  { %v367_v25 = vpack.c.bf16 %v158_v24, %v157_v23  ;;  %v60_v26 = vld [vmem:[#allocation2] sm:$0x3]  ;;  %v370_v29 = vpack.c.bf16 %v160_v28, %v159_v27  ;;  %v163_v33 = vld [vmem:[#allocation7 + $0x60] sm:$0xff]  ;;  %v164_v34 = vld [vmem:[#allocation7 + $0x68] sm:$0xff] }
  0x3e   :  { %350 = vmatpush3.bf16.msra.mxu0 %v349_v7  ;;  %v162_v31 = vld [vmem:[#allocation7 + $0x58] sm:$0xff]  ;;  %v376_v35 = vpack.c.bf16 %v164_v34, %v163_v33  ;;  %v165_v36 = vld [vmem:[#allocation7 + $0x70] sm:$0xff]  ;;  %p464_p0 = pnand %p463_p13, %p457_p10 }
  0x3f   :  { %351 = vmatprep.subr.bf16.mxu0 %v489_v0  ;;  %362 = vmatpush3.bf16.msra.mxu1 %v361_v15  ;;  %v373_v32 = vpack.c.bf16 %v162_v31, %v161_v30  ;;  %v166_v37 = vld [vmem:[#allocation7 + $0x78] sm:$0xff] }
  0x40   :  { %363 = vmatprep.subr.bf16.mxu1 %v489_v0  ;;  %v379_v38 = vpack.c.bf16 %v166_v37, %v165_v36  ;;  %v262_v39 = vld [vmem:[%s585_s2] ss:$0 sm:$0xff] }
  0x41   :  { %v264_v44 = vld [vmem:[%s587_s4] ss:$0 sm:$0xff] }
  0x42   :  { %353 = vmatpush3.bf16.msra.mxu0 %v352_v16 }
  0x43   :  { %354 = vmatprep.subr.bf16.mxu0 %v489_v0  ;;  %365 = vmatpush3.bf16.msra.mxu1 %v364_v21 }
  0x44   :  { %366 = vmatprep.subr.bf16.mxu1 %v489_v0 }
  0x46   :  { %356 = vmatpush3.bf16.msra.mxu0 %v355_v22 }
  0x47   :  { %368 = vmatpush3.bf16.msra.mxu1 %v367_v25 }
  0x48   :  { %369 = vmatprep.subr.bf16.mxu1 %v489_v0 }
  0x49   :  { %308 = vmatmul.mubr.msk.f32.vlgmr.msra.gmra.mrb[0].mxu0 %vm76_vm1, %v60_v26 }
  0x4b   :  { %371 = vmatpush3.bf16.msra.mxu1 %v370_v29 }
  0x4c   :  { %372 = vmatprep.subr.bf16.mxu1 %v489_v0 }
  0x4f   :  { %374 = vmatpush3.bf16.msra.mxu1 %v373_v32 }
  0x50   :  { %375 = vmatprep.subr.bf16.mxu1 %v489_v0 }
  0x53   :  { %377 = vmatpush3.bf16.msra.mxu1 %v376_v35 }
  0x54   :  { %378 = vmatprep.subr.bf16.mxu1 %v489_v0 }
  0x57   :  { %380 = vmatpush3.bf16.msra.mxu1 %v379_v38 }
 0x11c   :  { %v146_v40 = vpop.f32.mrb[0].mxu0 }
 0x11d   :  { %v147_v41 = vadd.f32 %v262_v39, %v146_v40  ;;  %v309_v42 = vpop.f32.mrb[1].mxu0 }
 0x11f   :  { %v150_v43 = vmax.f32 %v147_v41, 0.0 }
 0x121   :  { %343 = vmatmul.mubr.f32.vlgmr.msra.gmra.mrb[0].mxu1 %v150_v43 }
 0x1f4   :  { %v240_v45 = vpop.f32.mrb[0].mxu1 }
 0x1f5   :  { %v241_v46 = vadd.f32 %v264_v44, %v240_v45  ;;  %v344_v47 = vpop.f32.mrb[1].mxu1 }
 0x1f7   :  { %v244_v48 = vmax.f32 %v241_v46, 0.0 }
 0x1f9   :  { %245 = vst [vmem:[#allocation8] sm:$0x3] %v244_v48 }
 0x1fa   :  { %467 = shalt.err (!%p464_p0)
}
 0x1fb   :  { %s468_s11 = scalar_lea.hbm %s588_s5, 32 }
 0x1fc   :  { %p469_p1 = scmp.ne.s32.totalorder %s588_s5, %s468_s11  ;;  %p472_p2 = scmp.lt.u32.totalorder %s468_s11, %s588_s5 }
 0x1fe   :  { %p474_p3 = pnand %p472_p2, %p469_p1 }
 0x200   :  { %477 = shalt.err (!%p474_p3)
}
 0x201   :  { %255 = dma.vmem_to_hbm [thread:$0]  %s253_s8, 32, %s588_s5, [#allocation4]  }
 0x202   :  { %482 = dma.done.wait [#allocation4], 32  }
 0x203   :  { %483 = vsyncadd [#allocation4], 4294967264 }
 0x204   :  { %259 = vsyncpa [#allocation3], 1 }
 0x205   :  { %260 = vsyncpa [#allocation6], 1 }
 0x206   :  { %261 = vsyncpa [#allocation4], 1 }

</bundles_post_ra>
